<compile_context>
chip_gen: v7x
topology: tpu7x:2x2x1
jax: 0.10.0
libtpu: 0.0.40
codegen_flags: <defaults>
</compile_context>

<pallas_src>
import jax
import jax.numpy as jnp
from jax.experimental import pallas as pl
from jax.experimental.pallas import tpu as pltpu

HIDDEN = 256


def _round_up(n, m):
    return ((n + m - 1) // m) * m


def _ann_kernel(x_ref, w1_ref, b1_ref, w2_ref, b2_ref,
                w3_ref, b3_ref, w4_ref, b4_ref, o_ref):
    # x tile: (TB, in_dim) bf16 (cast in the wrapper).  Weights (fan_in, fan_out)
    # bf16, biases (1, fan_out) f32.  Each layer: bf16 MXU matmul with f32
    # accumulation, bias add, ReLU.  Dropout(eval) = identity.
    h = x_ref[...]

    h = jnp.dot(h, w1_ref[...], preferred_element_type=jnp.float32) + b1_ref[...]
    h = jnp.maximum(h, 0.0)

    h = jnp.dot(h.astype(jnp.bfloat16), w2_ref[...],
                preferred_element_type=jnp.float32) + b2_ref[...]
    h = jnp.maximum(h, 0.0)

    h = jnp.dot(h.astype(jnp.bfloat16), w3_ref[...],
                preferred_element_type=jnp.float32) + b3_ref[...]
    h = jnp.maximum(h, 0.0)

    h = jnp.dot(h.astype(jnp.bfloat16), w4_ref[...],
                preferred_element_type=jnp.float32) + b4_ref[...]
    h = jnp.maximum(h, 0.0)                      # final ReLU

    # bf16 writeback halves HBM traffic on the (heavily padded) output tile.
    o_ref[...] = h.astype(o_ref.dtype)


def _choose_tb(batch, tb):
    """Batch tile: multiple of 16 (bf16 sublane pack), large enough to amortize
    per-grid-step overhead, but capped so large batches still get >= 2 grid
    steps (keeps both v7x TensorCores busy on the 'parallel' axis)."""
    tb_eff = min(tb, _round_up(batch, 16))
    tb_eff = _round_up(tb_eff, 16)
    while tb_eff >= 512 and pl.cdiv(batch, tb_eff) < 2:
        tb_eff //= 2
    return tb_eff


def ann_forward(x, params, *, tb=2048):
    """x: (B, in_dim) float32.  params: w1..w4 bf16 (fan_in, fan_out),
    b1..b4 f32 (1, fan_out).  Returns (B, out_dim) float32 (eval-mode dropout)."""
    B, in_dim = x.shape
    out_dim = params["b4"].shape[1]

    # Lane-dense output: pad the final layer to a multiple of 128 columns so the
    # HBM writeback uses unmasked stores.  Padded columns come from zero weights
    # and zero bias, so they are exact zeros and are sliced off below.
    n_pad = _round_up(out_dim, 128)
    w4, b4 = params["w4"], params["b4"]
    if n_pad != out_dim:
        w4 = jnp.pad(w4, ((0, 0), (0, n_pad - out_dim)))
        b4 = jnp.pad(b4, ((0, 0), (0, n_pad - out_dim)))

    # Batch tiling.
    tb_eff = _choose_tb(B, tb)
    b_pad = _round_up(B, tb_eff)

    # Cast x to bf16 in the wrapper: halves the x DMA bytes per tile.
    xb = x.astype(jnp.bfloat16)
    if b_pad != B:
        xb = jnp.pad(xb, ((0, b_pad - B), (0, 0)))

    grid = (b_pad // tb_eff,)

    # x / out stream per grid step (double-buffered); weights & biases use
    # constant index maps (fetched once, VMEM-resident) with single buffering.
    x_spec = pl.BlockSpec((tb_eff, in_dim), lambda i: (i, 0))
    out_spec = pl.BlockSpec((tb_eff, n_pad), lambda i: (i, 0))

    def const(a):
        return pl.BlockSpec(a.shape, lambda i: (0,) * a.ndim,
                            pipeline_mode=pl.Buffered(1))

    args = (xb,
            params["w1"], params["b1"],
            params["w2"], params["b2"],
            params["w3"], params["b3"],
            w4, b4)
    in_specs = [x_spec] + [const(a) for a in args[1:]]

    # Advisory cost estimate for XLA scheduling around the custom call.
    w_bytes = sum(int(a.size) * a.dtype.itemsize for a in args[1:])
    flops = 2 * b_pad * (in_dim * HIDDEN + 2 * HIDDEN * HIDDEN + HIDDEN * n_pad)
    bytes_accessed = b_pad * in_dim * 2 + b_pad * n_pad * 2 + w_bytes
    cost = pl.CostEstimate(flops=flops, transcendentals=0,
                           bytes_accessed=bytes_accessed)

    # Scoped-VMEM budget: double-buffered bf16 x/out tiles + resident weights +
    # generous allowance for f32 intermediates + headroom.  Floor at 32 MiB
    # (safe on all generations; well under v7x's 64 MiB physical).
    vmem_est = (2 * tb_eff * (in_dim + n_pad) * 2     # bf16 x/out, double buffered
                + 6 * tb_eff * HIDDEN * 4             # f32 intermediates
                + w_bytes + (4 << 20))                # weights + headroom
    vmem_limit = max(int(vmem_est), 32 * 1024 * 1024)

    out = pl.pallas_call(
        _ann_kernel,
        out_shape=jax.ShapeDtypeStruct((b_pad, n_pad), jnp.bfloat16),
        grid=grid,
        in_specs=in_specs,
        out_specs=out_spec,
        compiler_params=pltpu.CompilerParams(
            dimension_semantics=("parallel",),
            vmem_limit_bytes=vmem_limit,
        ),
        cost_estimate=cost,
    )(*args)

    return out[:B, :out_dim].astype(jnp.float32)


def init_params(key, in_dim, out_dim):
    """Deterministic synthetic init (nn.Linear shapes, transposed to (fan_in, fan_out)).
    Weights stored in bf16 (MXU operand dtype); biases kept f32 (1, fan_out)."""
    ks = jax.random.split(key, 8)

    def lin(kw, kb, fan_in, fan_out):
        bound = 1.0 / jnp.sqrt(fan_in)
        w = jax.random.uniform(kw, (fan_in, fan_out), jnp.float32, -bound, bound)
        b = jax.random.uniform(kb, (1, fan_out), jnp.float32, -bound, bound)
        return w.astype(jnp.bfloat16), b

    w1, b1 = lin(ks[0], ks[1], in_dim, HIDDEN)
    w2, b2 = lin(ks[2], ks[3], HIDDEN, HIDDEN)
    w3, b3 = lin(ks[4], ks[5], HIDDEN, HIDDEN)
    w4, b4 = lin(ks[6], ks[7], HIDDEN, out_dim)
    return dict(w1=w1, b1=b1, w2=w2, b2=b2, w3=w3, b3=b3, w4=w4, b4=b4)


def ann_reference(x, p):
    """Pure-JAX reference mirroring the kernel math: bf16 operands, f32
    accumulation, eval-mode dropout, bf16 output writeback."""
    def layer(h, w, b):
        return jnp.maximum(
            jnp.dot(h.astype(jnp.bfloat16), w,
                    preferred_element_type=jnp.float32) + b, 0.0)
    h = layer(x, p["w1"], p["b1"])
    h = layer(h, p["w2"], p["b2"])
    h = layer(h, p["w3"], p["b3"])
    h = layer(h, p["w4"], p["b4"])
    return h.astype(jnp.bfloat16).astype(jnp.float32)


if __name__ == "__main__":
    B, IN_DIM, OUT_DIM = 24, 32, 8

    key = jax.random.PRNGKey(0)
    kx, kp = jax.random.split(key)
    x = jax.random.normal(kx, (B, IN_DIM), jnp.float32)
    params = init_params(kp, IN_DIM, OUT_DIM)

    # Small batch tile (tb=8 -> rounded to 16) so the test exercises a
    # multi-step batch grid.
    out = ann_forward(x, params, tb=8)
    out = jax.block_until_ready(out)

    ref = ann_reference(x, params)
    assert out.shape == (B, OUT_DIM), out.shape
    assert jnp.allclose(out, ref, atol=2e-2, rtol=2e-2), \
        float(jnp.max(jnp.abs(out - ref)))

    print("KERNEL_OK")
</pallas_src>

<mosaic_0001>
module attributes {stable_mosaic.version = 11 : i64} {
  func.func @_ann_kernel(%arg0: i32, %arg1: memref<16x32xbf16, #tpu.memory_space<vmem>>, %arg2: memref<32x256xbf16, #tpu.memory_space<vmem>>, %arg3: memref<1x256xf32, #tpu.memory_space<vmem>>, %arg4: memref<256x256xbf16, #tpu.memory_space<vmem>>, %arg5: memref<1x256xf32, #tpu.memory_space<vmem>>, %arg6: memref<256x256xbf16, #tpu.memory_space<vmem>>, %arg7: memref<1x256xf32, #tpu.memory_space<vmem>>, %arg8: memref<256x128xbf16, #tpu.memory_space<vmem>>, %arg9: memref<1x128xf32, #tpu.memory_space<vmem>>, %arg10: memref<16x128xbf16, #tpu.memory_space<vmem>>) attributes {dimension_semantics = [#tpu.dimension_semantics<parallel>], iteration_bounds = array<i64: 2>, scalar_prefetch = 0 : i64, scratch_operands = 0 : i64, tpu.core_type = #tpu.core_type<tc>, window_params = [{transform_indices = @transform_0, window_bounds = array<i64: 16, 32>}, {pipeline_mode = #tpu.pipeline_mode<synchronous>, transform_indices = @transform_1, window_bounds = array<i64: 32, 256>}, {pipeline_mode = #tpu.pipeline_mode<synchronous>, transform_indices = @transform_2, window_bounds = array<i64: 1, 256>}, {pipeline_mode = #tpu.pipeline_mode<synchronous>, transform_indices = @transform_3, window_bounds = array<i64: 256, 256>}, {pipeline_mode = #tpu.pipeline_mode<synchronous>, transform_indices = @transform_4, window_bounds = array<i64: 1, 256>}, {pipeline_mode = #tpu.pipeline_mode<synchronous>, transform_indices = @transform_5, window_bounds = array<i64: 256, 256>}, {pipeline_mode = #tpu.pipeline_mode<synchronous>, transform_indices = @transform_6, window_bounds = array<i64: 1, 256>}, {pipeline_mode = #tpu.pipeline_mode<synchronous>, transform_indices = @transform_7, window_bounds = array<i64: 256, 128>}, {pipeline_mode = #tpu.pipeline_mode<synchronous>, transform_indices = @transform_8, window_bounds = array<i64: 1, 128>}, {transform_indices = @transform_9, window_bounds = array<i64: 16, 128>}]} {
    %c0 = arith.constant 0 : index
    %c0_0 = arith.constant 0 : index
    %0 = vector.load %arg1[%c0, %c0_0] : memref<16x32xbf16, #tpu.memory_space<vmem>>, vector<16x32xbf16>
    %c0_1 = arith.constant 0 : index
    %c0_2 = arith.constant 0 : index
    %1 = vector.load %arg2[%c0_1, %c0_2] : memref<32x256xbf16, #tpu.memory_space<vmem>>, vector<32x256xbf16>
    %cst = arith.constant dense<0.000000e+00> : vector<16x256xf32>
    %2 = tpu.matmul %0, %1, %cst {dimension_numbers = #tpu.dot_dimension_numbers<[1], [0], [0], [1], [0, 0, 1, 1], [], []>} : vector<16x32xbf16>, vector<32x256xbf16>, vector<16x256xf32> -> vector<16x256xf32>
    %c0_3 = arith.constant 0 : index
    %c0_4 = arith.constant 0 : index
    %3 = vector.load %arg3[%c0_3, %c0_4] : memref<1x256xf32, #tpu.memory_space<vmem>>, vector<1x256xf32>
    %4 = vector.broadcast %3 : vector<1x256xf32> to vector<16x256xf32>
    %5 = arith.addf %2, %4 : vector<16x256xf32>
    %cst_5 = arith.constant 0.000000e+00 : f32
    %6 = vector.broadcast %cst_5 : f32 to vector<16x256xf32>
    %7 = arith.maximumf %5, %6 : vector<16x256xf32>
    %8 = arith.truncf %7 : vector<16x256xf32> to vector<16x256xbf16>
    %c0_6 = arith.constant 0 : index
    %c0_7 = arith.constant 0 : index
    %9 = vector.load %arg4[%c0_6, %c0_7] : memref<256x256xbf16, #tpu.memory_space<vmem>>, vector<256x256xbf16>
    %cst_8 = arith.constant dense<0.000000e+00> : vector<16x256xf32>
    %10 = tpu.matmul %8, %9, %cst_8 {dimension_numbers = #tpu.dot_dimension_numbers<[1], [0], [0], [1], [0, 0, 1, 1], [], []>} : vector<16x256xbf16>, vector<256x256xbf16>, vector<16x256xf32> -> vector<16x256xf32>
    %c0_9 = arith.constant 0 : index
    %c0_10 = arith.constant 0 : index
    %11 = vector.load %arg5[%c0_9, %c0_10] : memref<1x256xf32, #tpu.memory_space<vmem>>, vector<1x256xf32>
    %12 = vector.broadcast %11 : vector<1x256xf32> to vector<16x256xf32>
    %13 = arith.addf %10, %12 : vector<16x256xf32>
    %cst_11 = arith.constant 0.000000e+00 : f32
    %14 = vector.broadcast %cst_11 : f32 to vector<16x256xf32>
    %15 = arith.maximumf %13, %14 : vector<16x256xf32>
    %16 = arith.truncf %15 : vector<16x256xf32> to vector<16x256xbf16>
    %c0_12 = arith.constant 0 : index
    %c0_13 = arith.constant 0 : index
    %17 = vector.load %arg6[%c0_12, %c0_13] : memref<256x256xbf16, #tpu.memory_space<vmem>>, vector<256x256xbf16>
    %cst_14 = arith.constant dense<0.000000e+00> : vector<16x256xf32>
    %18 = tpu.matmul %16, %17, %cst_14 {dimension_numbers = #tpu.dot_dimension_numbers<[1], [0], [0], [1], [0, 0, 1, 1], [], []>} : vector<16x256xbf16>, vector<256x256xbf16>, vector<16x256xf32> -> vector<16x256xf32>
    %c0_15 = arith.constant 0 : index
    %c0_16 = arith.constant 0 : index
    %19 = vector.load %arg7[%c0_15, %c0_16] : memref<1x256xf32, #tpu.memory_space<vmem>>, vector<1x256xf32>
    %20 = vector.broadcast %19 : vector<1x256xf32> to vector<16x256xf32>
    %21 = arith.addf %18, %20 : vector<16x256xf32>
    %cst_17 = arith.constant 0.000000e+00 : f32
    %22 = vector.broadcast %cst_17 : f32 to vector<16x256xf32>
    %23 = arith.maximumf %21, %22 : vector<16x256xf32>
    %24 = arith.truncf %23 : vector<16x256xf32> to vector<16x256xbf16>
    %c0_18 = arith.constant 0 : index
    %c0_19 = arith.constant 0 : index
    %25 = vector.load %arg8[%c0_18, %c0_19] : memref<256x128xbf16, #tpu.memory_space<vmem>>, vector<256x128xbf16>
    %cst_20 = arith.constant dense<0.000000e+00> : vector<16x128xf32>
    %26 = tpu.matmul %24, %25, %cst_20 {dimension_numbers = #tpu.dot_dimension_numbers<[1], [0], [0], [1], [0, 0, 1, 1], [], []>} : vector<16x256xbf16>, vector<256x128xbf16>, vector<16x128xf32> -> vector<16x128xf32>
    %c0_21 = arith.constant 0 : index
    %c0_22 = arith.constant 0 : index
    %27 = vector.load %arg9[%c0_21, %c0_22] : memref<1x128xf32, #tpu.memory_space<vmem>>, vector<1x128xf32>
    %28 = vector.broadcast %27 : vector<1x128xf32> to vector<16x128xf32>
    %29 = arith.addf %26, %28 : vector<16x128xf32>
    %cst_23 = arith.constant 0.000000e+00 : f32
    %30 = vector.broadcast %cst_23 : f32 to vector<16x128xf32>
    %31 = arith.maximumf %29, %30 : vector<16x128xf32>
    %32 = arith.truncf %31 : vector<16x128xf32> to vector<16x128xbf16>
    %c0_24 = arith.constant 0 : index
    %c0_25 = arith.constant 0 : index
    %33 = vector.load %arg10[%c0_24, %c0_25] : memref<16x128xbf16, #tpu.memory_space<vmem>>, vector<16x128xbf16>
    tpu.vector_store %arg10[%c0_24, %c0_25], %32 {strides = array<i32>} : memref<16x128xbf16, #tpu.memory_space<vmem>>, vector<16x128xbf16>,
    return
  }
  func.func @transform_0(%arg0: i32) -> (i32, i32) {
    %c0_i32 = arith.constant 0 : i32
    %c0_i32_0 = arith.constant 0 : i32
    return %arg0, %c0_i32 : i32, i32
  }
  func.func @transform_1(%arg0: i32) -> (i32, i32) {
    %c0_i32 = arith.constant 0 : i32
    %c0_i32_0 = arith.constant 0 : i32
    %c0_i32_1 = arith.constant 0 : i32
    return %c0_i32, %c0_i32_0 : i32, i32
  }
  func.func @transform_2(%arg0: i32) -> (i32, i32) {
    %c0_i32 = arith.constant 0 : i32
    %c0_i32_0 = arith.constant 0 : i32
    %c0_i32_1 = arith.constant 0 : i32
    return %c0_i32, %c0_i32_0 : i32, i32
  }
  func.func @transform_3(%arg0: i32) -> (i32, i32) {
    %c0_i32 = arith.constant 0 : i32
    %c0_i32_0 = arith.constant 0 : i32
    %c0_i32_1 = arith.constant 0 : i32
    return %c0_i32, %c0_i32_0 : i32, i32
  }
  func.func @transform_4(%arg0: i32) -> (i32, i32) {
    %c0_i32 = arith.constant 0 : i32
    %c0_i32_0 = arith.constant 0 : i32
    %c0_i32_1 = arith.constant 0 : i32
    return %c0_i32, %c0_i32_0 : i32, i32
  }
  func.func @transform_5(%arg0: i32) -> (i32, i32) {
    %c0_i32 = arith.constant 0 : i32
    %c0_i32_0 = arith.constant 0 : i32
    %c0_i32_1 = arith.constant 0 : i32
    return %c0_i32, %c0_i32_0 : i32, i32
  }
  func.func @transform_6(%arg0: i32) -> (i32, i32) {
    %c0_i32 = arith.constant 0 : i32
    %c0_i32_0 = arith.constant 0 : i32
    %c0_i32_1 = arith.constant 0 : i32
    return %c0_i32, %c0_i32_0 : i32, i32
  }
  func.func @transform_7(%arg0: i32) -> (i32, i32) {
    %c0_i32 = arith.constant 0 : i32
    %c0_i32_0 = arith.constant 0 : i32
    %c0_i32_1 = arith.constant 0 : i32
    return %c0_i32, %c0_i32_0 : i32, i32
  }
  func.func @transform_8(%arg0: i32) -> (i32, i32) {
    %c0_i32 = arith.constant 0 : i32
    %c0_i32_0 = arith.constant 0 : i32
    %c0_i32_1 = arith.constant 0 : i32
    return %c0_i32, %c0_i32_0 : i32, i32
  }
  func.func @transform_9(%arg0: i32) -> (i32, i32) {
    %c0_i32 = arith.constant 0 : i32
    %c0_i32_0 = arith.constant 0 : i32
    return %arg0, %c0_i32 : i32, i32
  }
}

</mosaic_0001>

<bundles_post_ra>
// kernel: tpu_custom_call.1
= control target key start
LH: loop header
LB: loop body
LE: loop exit
PB: predicated region body
PF: predicated region fallthrough
CT: control target
= control target key end

     0   :  { %s2281_s0 = inlined_call_operand.hbm [shape: bf16[32,32], index: 0, kind: input, shape index: {}]   ;;  %s2282_s1 = inlined_call_operand.hbm [shape: bf16[32,256], index: 1, kind: input, shape index: {}]   ;;  %s2283_s2 = inlined_call_operand.vmem [shape: f32[1,256], index: 2, kind: input, shape index: {}]   ;;  %s2284_s3 = inlined_call_operand.hbm [shape: bf16[256,256], index: 3, kind: input, shape index: {}]   ;;  %s2285_s4 = inlined_call_operand.vmem [shape: f32[1,256], index: 4, kind: input, shape index: {}]   ;;  %s2286_s5 = inlined_call_operand.hbm [shape: bf16[256,256], index: 5, kind: input, shape index: {}]   ;;  %s2287_s6 = inlined_call_operand.vmem [shape: f32[1,256], index: 6, kind: input, shape index: {}]   ;;  %s2288_s7 = inlined_call_operand.hbm [shape: bf16[256,128], index: 7, kind: input, shape index: {}]   ;;  %s2289_s8 = inlined_call_operand.vmem [shape: f32[1,128], index: 8, kind: input, shape index: {}]   ;;  %s2290_s9 = inlined_call_operand.hbm [shape: bf16[32,128], index: 9, kind: output, shape index: {}]  }
   0x1   :  { %2297 = sst [smem:[#allocation18_spill]] %s2290_s9 }
   0x2   :  { %14 = vsyncpa [#allocation3], 0 }
   0x3   :  { %16 = vsyncpa [#allocation3 + $0x1], 0 }
   0x4   :  { %17 = vsyncpa [#allocation6], 0 }
   0x5   :  { %18 = vsyncpa [#allocation9], 0 }
   0x6   :  { %19 = vsyncpa [#allocation4], 0 }
   0x7   :  { %21 = vsyncpa [#allocation4 + $0x1], 0  ;;  %s1963_s30 = smov 0   ;;  %s1965_s10 = smov 0  }
   0x8   :  { %s1967_s11 = smov 0   ;;  %s1969_s12 = smov 0  }
   0x9 LB: > { %2298 = sst [smem:[#allocation16_spill]] %s1886_s30  ;;  %s1984_s13 = sadd.s32 4294967295, %s1898_s12   ;;  %s1898_s12 = sphi %s1969_s12, %s2322_s12   ;;  %s1894_s11 = sphi %s1967_s11, %s2321_s11   ;;  %s1890_s10 = sphi %s1965_s10, %s2320_s10   ;;  %s1886_s30 = sphi %s1963_s30, %s2319_s30  }
   0xa   : > { %s1327_s14 = sadd.s32 4294967294, %s1898_s12   ;;  %p47_p0 = scmp.ne.s32.totalorder %s1890_s10, %s1886_s30 }
   0xb   : > { %p2291_p1 = scmp.eq.s32.totalorder %s1984_s13, 0  ;;  %p245_p3 = scmp.eq.s32.totalorder %s1327_s14, 1 }
   0xc   : > { %p1328_p5 = scmp.ge.s32.totalorder %s1898_s12, 1  ;;  %p252_p7 = scmp.lt.s32.totalorder %s1898_s12, 3 }
   0xd   : > { %p1993_p4 = por %p2291_p1, %p47_p0  ;;  %p1998_p6 = por %p245_p3, %p47_p0 }
   0xe   : > { %p2003_p8 = pnand %p1328_p5, %p252_p7  ;;  %s1900_s18 = smov [#allocation5]  }
   0xf   : > { %s2299_s15 = scalar_select %p1993_p4, 1, 0 }
  0x10   : > { %s2300_s16 = scalar_select %p1998_p6, 1, 0 }
  0x11   : > { %s2302_s17 = scalar_select %p2003_p8, 1, 0 }
  0x12   : > { %2301 = sst [smem:[#allocation17_spill]] %s2300_s16  ;;  %s264_s19 = sshll.u32 %s1900_s18, 4  ;;  %s2007_s19 = int_to_ptr.vmem [resolvable:$true] %s264_s19 }
  0x13   : > { %p1489_p9 = pneg %p2003_p8  ;;  %s1901_s21 = smov [#allocation8]  }
  0x14   : > { %s296_s22 = sshll.u32 %s1901_s21, 4  ;;  %s1902_s23 = smov [#allocation7]   ;;  %s2018_s22 = int_to_ptr.vmem [resolvable:$true] %s296_s22 }
  0x15   : > { %p2014_p11 = pnand %p1489_p9, %p2291_p1  ;;  %s2020_s24 = sshll.u32 %s1902_s23, 4  ;;  %s281_s24 = int_to_ptr.vmem [resolvable:$true] %s2020_s24 }
  0x16   : > { %s1682_s27 = scalar_lea.hbm %s2282_s1, 512 }
  0x17   : > { %p1683_p12 = scmp.ne.s32.totalorder %s2282_s1, %s1682_s27  ;;  %p2030_p13 = pneg %p2014_p11 }
  0x18   : > { %p1689_p5 = scmp.lt.u32.totalorder %s1682_s27, %s2282_s1 }
  0x19   : > { %p1685_p0 = pnand %p2030_p13, %p1683_p12 }
  0x1b   : > { %p1686_p3 = pneg %p1685_p0 }
  0x1d   : > { %p1691_p7 = pnand %p1689_p5, %p1686_p3 }
  0x1f   : > { %1694 = shalt.err (!%p1691_p7)
}
  0x20   : > { %s1695_s23 = scalar_lea.vmem %s2007_s19, 512  ;;  %p1703_p2 = scmp.lt.s32.totalorder %s2007_s19, %s2007_s19 }
  0x21   : > { %p1696_p9 = scmp.ne.s32.totalorder %s2007_s19, %s1695_s23  ;;  %p1704_p6 = scmp.lt.s32.totalorder %s1695_s23, %s1695_s23 }
  0x23   : > { %p1698_p10 = pnand %p1696_p9, %p2030_p13  ;;  %p1705_p12 = por %p1704_p6, %p1703_p2 }
  0x25   : > { %p1699_p1 = pneg %p1698_p10 }
  0x27   : > { %p1706_p0 = pnand %p1705_p12, %p1699_p1 }
  0x29   : > { %1709 = shalt.err (!%p1706_p0)
}
  0x2a   : > { %s1903_s25 = smov 128   ;;  %s1904_s26 = smov 8  }
  0x2b   : > { %1492 = dma.hbm_to_vmem [thread:$0]  (!%p2014_p11), %s2282_s1, 512, %s2007_s19, [#allocation6], %s1903_s25, %s1903_s25, %s1904_s26  }
  0x2c   : > { %s1710_s21 = scalar_lea.hbm %s2286_s5, 4096 }
  0x2d   : > { %p1711_p1 = scmp.ne.s32.totalorder %s2286_s5, %s1710_s21  ;;  %p1717_p10 = scmp.lt.u32.totalorder %s1710_s21, %s2286_s5 }
  0x2f   : > { %p1713_p2 = pnand %p1711_p1, %p2030_p13 }
  0x31   : > { %p1714_p6 = pneg %p1713_p2 }
  0x33   : > { %p1719_p3 = pnand %p1717_p10, %p1714_p6 }
  0x35   : > { %1722 = shalt.err (!%p1719_p3)
}
  0x36   : > { %s1723_s19 = scalar_lea.vmem %s2018_s22, 4096  ;;  %p1731_p12 = scmp.lt.s32.totalorder %s2018_s22, %s2018_s22 }
  0x37   : > { %p1724_p5 = scmp.ne.s32.totalorder %s2018_s22, %s1723_s19  ;;  %p1732_p0 = scmp.lt.s32.totalorder %s1723_s19, %s1723_s19 }
  0x39   : > { %p1726_p7 = pnand %p1724_p5, %p2030_p13  ;;  %p1733_p1 = por %p1732_p0, %p1731_p12 }
  0x3b   : > { %p1727_p9 = pneg %p1726_p7 }
  0x3d   : > { %p1734_p2 = pnand %p1733_p1, %p1727_p9 }
  0x3f   : > { %1737 = shalt.err (!%p1734_p2)
}
  0x40   : > { %1498 = dma.hbm_to_vmem [thread:$0]  (!%p2014_p11), %s2286_s5, 4096, %s2018_s22, [#allocation9], %s1903_s25, %s1903_s25, %s1904_s26  }
  0x41   : > { %s1738_s28 = scalar_lea.hbm %s2284_s3, 4096 }
  0x42   : > { %p1739_p6 = scmp.ne.s32.totalorder %s2284_s3, %s1738_s28  ;;  %p1745_p5 = scmp.lt.u32.totalorder %s1738_s28, %s2284_s3 }
  0x44   : > { %p1741_p10 = pnand %p1739_p6, %p2030_p13 }
  0x46   : > { %p1742_p3 = pneg %p1741_p10 }
  0x48   : > { %p1747_p7 = pnand %p1745_p5, %p1742_p3 }
  0x4a   : > { %1750 = shalt.err (!%p1747_p7)
}
  0x4b   : > { %s1751_s19 = scalar_lea.vmem %s281_s24, 4096  ;;  %p1759_p1 = scmp.lt.s32.totalorder %s281_s24, %s281_s24 }
  0x4c   : > { %p1752_p9 = scmp.ne.s32.totalorder %s281_s24, %s1751_s19  ;;  %p1760_p2 = scmp.lt.s32.totalorder %s1751_s19, %s1751_s19 }
  0x4e   : > { %p1754_p12 = pnand %p1752_p9, %p2030_p13  ;;  %p1761_p4 = por %p1760_p2, %p1759_p1 }
  0x50   : > { %p1755_p0 = pneg %p1754_p12 }
  0x52   : > { %p1762_p8 = pnand %p1761_p4, %p1755_p0 }
  0x54   : > { %1765 = shalt.err (!%p1762_p8)
}
  0x55   : > { %1495 = dma.hbm_to_vmem [thread:$0]  (!%p2014_p11), %s2284_s3, 4096, %s281_s24, [#allocation6], %s1903_s25, %s1903_s25, %s1904_s26  }
  0x56   : > { %s1905_s30 = smov [#allocation10]   ;;  %s1766_s29 = scalar_lea.hbm %s2288_s7, 2048 }
  0x57   : > { %s312_s16 = sshll.u32 %s1905_s30, 4  ;;  %p1767_p4 = scmp.ne.s32.totalorder %s2288_s7, %s1766_s29  ;;  %s313_s16 = int_to_ptr.vmem [resolvable:$true] %s312_s16 }
  0x58   : > { %p1773_p10 = scmp.lt.u32.totalorder %s1766_s29, %s2288_s7 }
  0x59   : > { %p1769_p8 = pnand %p1767_p4, %p2030_p13 }
  0x5b   : > { %p1770_p6 = pneg %p1769_p8 }
  0x5d   : > { %p1775_p3 = pnand %p1773_p10, %p1770_p6 }
  0x5f   : > { %1778 = shalt.err (!%p1775_p3)
}
  0x60   : > { %s1779_s24 = scalar_lea.vmem %s313_s16, 2048  ;;  %p1787_p12 = scmp.lt.s32.totalorder %s313_s16, %s313_s16 }
  0x61   : > { %p1780_p5 = scmp.ne.s32.totalorder %s313_s16, %s1779_s24  ;;  %p1788_p0 = scmp.lt.s32.totalorder %s1779_s24, %s1779_s24 }
  0x63   : > { %p1782_p7 = pnand %p1780_p5, %p2030_p13  ;;  %p1789_p1 = por %p1788_p0, %p1787_p12 }
  0x65   : > { %p1783_p9 = pneg %p1782_p7 }
  0x67   : > { %p1790_p2 = pnand %p1789_p1, %p1783_p9 }
  0x69   : > { %1793 = shalt.err (!%p1790_p2)
}
  0x6a   : > { %s1906_s25 = smov 64   ;;  %s1907_s14 = smov 4  }
  0x6b   : > { %1501 = dma.hbm_to_vmem [thread:$0]  (!%p2014_p11), %s2288_s7, 2048, %s313_s16, [#allocation9], %s1906_s25, %s1906_s25, %s1907_s14  }
  0x6c   : > { %s2124_s9 = sadd.s32 1, %s1898_s12   ;;  %s34_s27 = sadd.s32 1, %s1894_s11 }
  0x6d   : > { %s31_s30 = ssub.s32 %s1898_s12, %s2124_s9  ;;  %p41_p4 = scmp.ne.s32.totalorder %s1894_s11, %s1890_s10 }
  0x6e   : > { %p32_p13 = scmp.eq.s32.totalorder %s31_s30, 0  ;;  %p42_p8 = scmp.eq.s32.totalorder %s1898_s12, 0 }
  0x6f   : > { %p2305_p10 = scmp.eq.s32.totalorder %s1984_s13, 1  ;;  %p1514_p5 = scmp.lt.s32.totalorder %s1898_s12, 2 }
  0x70   : > { %s2133_s28 = scalar_select %p32_p13, %s1894_s11, %s34_s27  }
  0x71   : > { %p43_p6 = por %p42_p8, %p41_p4  ;;  %p2137_p3 = por %p2305_p10, %p41_p4 }
  0x72   : > { %s329_s29 = sand.u32 1, %s1894_s11   ;;  %s1438_s16 = sshll.u32 %s1898_s12, 7 }
  0x73   : > { %s1334_s18 = sshll.u32 %s329_s29, 3  ;;  %s2147_s19 = scalar_lea.hbm %s2281_s0, %s1438_s16 }
  0x74   : > { %s333_s24 = scalar_lea.vmem [#allocation2], %s1334_s18  ;;  %p2151_p11 = pnand %p1514_p5, %p43_p6 }
  0x75   : > { %s340_s26 = sshll.u32 %s333_s24, 4  ;;  %s2155_s30 = scalar_lea.sflag [#allocation3], %s329_s29  ;;  %s2149_s26 = int_to_ptr.vmem [resolvable:$true] %s340_s26 }
  0x76   : > { %s1794_s27 = scalar_lea.hbm %s2147_s19, 128  ;;  %p1796_p9 = pneg %p2151_p11 }
  0x77   : > { %p1795_p7 = scmp.ne.s32.totalorder %s2147_s19, %s1794_s27  ;;  %s1799_s21 = scalar_lea.hbm %s2281_s0, 256 }
  0x78   : > { %p1800_p1 = scmp.lt.u32.totalorder %s2147_s19, %s2281_s0  ;;  %p1801_p2 = scmp.lt.u32.totalorder %s1799_s21, %s1794_s27 }
  0x79   : > { %p1797_p12 = pnand %p1796_p9, %p1795_p7  ;;  %p1803_p4 = scmp.lt.u32.totalorder %s1794_s27, %s2147_s19 }
  0x7a   : > { %p1802_p13 = por %p1801_p2, %p1800_p1 }
  0x7b   : > { %p1798_p0 = pneg %p1797_p12 }
  0x7c   : > { %p1804_p8 = por %p1803_p4, %p1802_p13 }
  0x7e   : > { %p1805_p6 = pnand %p1804_p8, %p1798_p0 }
  0x80   : > { %1808 = shalt.err (!%p1805_p6)
}
  0x81   : > { %s1809_s29 = scalar_lea.vmem %s2149_s26, 128  ;;  %s1908_s18 = smov [#allocation2]  }
  0x82   : > { %p1810_p10 = scmp.ne.s32.totalorder %s2149_s26, %s1809_s29  ;;  %s1814_s16 = sshll.u32 %s1908_s18, 4  ;;  %s1815_s16 = int_to_ptr.vmem [resolvable:$false] %s1814_s16 }
  0x83   : > { %s1816_s23 = scalar_lea.vmem %s1815_s16, 256  ;;  %p1817_p12 = scmp.lt.s32.totalorder %s2149_s26, %s1815_s16 }
  0x84   : > { %p1812_p5 = pnand %p1810_p10, %p1796_p9  ;;  %p1818_p1 = scmp.lt.s32.totalorder %s1816_s23, %s1809_s29 }
  0x86   : > { %p1813_p7 = pneg %p1812_p5  ;;  %p1819_p2 = por %p1818_p1, %p1817_p12 }
  0x88   : > { %p1820_p13 = pnand %p1819_p2, %p1813_p7 }
  0x8a   : > { %1823 = shalt.err (!%p1820_p13)
}
  0x8b   : > { %1505 = dma.hbm_to_vmem [thread:$0]  (!%p2151_p11), %s2147_s19, 128, %s2149_s26, %s2155_s30, %s1906_s25, %s1906_s25, %s1907_s14  }
  0x8c   : > { %p2308_p9 = scmp.ne.s32.totalorder %s2302_s17, 0 }
  0x8d   : > { %s2189_s27 = sand.u32 (!%p2308_p9), 1, %s1890_s10   ;;  %p2309_p0 = scmp.ne.s32.totalorder (!%p2308_p9), %s2299_s15, 0 }
  0x8e   : > { %352 = sbr.rel (%p2308_p9) target bundleno = 1070 (0x42e), region = 56  ;;  %s1338_s21 = sshll.u32 (!%p2308_p9), %s2189_s27, 3 }
  0x8f   : > { %s355_s24 = scalar_lea.sflag (!%p2308_p9), [#allocation3], %s2189_s27  ;;  %s358_s22 = scalar_lea.vmem (!%p2308_p9), [#allocation2], %s1338_s21 }
  0x95   : > { %1869 = dma.done.wait (%p2309_p0), %s355_s24, 128  }
  0x96   : > { %1871 = vsyncadd (%p2309_p0), %s355_s24, 4294967168  ;;  %p2310_p11 = scmp.eq.s32.totalorder %s1984_s13, 0 }
  0x98   : > { %1873 = dma.done.wait (%p2310_p11), [#allocation6], 4608   ;;  %p2311_p4 = pmov %p2310_p11 }
  0x9a   : > { %1875 = vsyncadd (%p2311_p4), [#allocation6], 4294962688  ;;  %p2312_p8 = pmov %p2311_p4 }
  0x9b   : > { %p2313_p6 = pmov %p2311_p4 }
  0x9c   : > { %1877 = dma.done.wait (%p2312_p8), [#allocation9], 6144  }
  0x9d   : > { %1879 = vsyncadd (%p2313_p6), [#allocation9], 4294961152  ;;  %v1909_v0 = vmov 0   ;;  %v1563_v1 = vld [vmem:[#allocation5 + $0x4] ss:$8 sps:$4 sm:$0xff]   ;;  %v1569_v8 = vld [vmem:[%s358_s22] sm:$0xff]  }
  0x9e   : > { %491 = vmatprep.mubr.bf16.mxu0 %v1909_v0  ;;  %v1565_v2 = vld [vmem:[#allocation5] ss:$8 sps:$4 sm:$0xff]   ;;  %459 = vmatprep.subr.bf16.mxu0 %v1563_v1  ;;  %v1566_v3 = vld [vmem:[#allocation5 + $0x14] ss:$8 sps:$4 sm:$0xff]   ;;  %v1568_v4 = vld [vmem:[#allocation5 + $0x10] ss:$8 sps:$4 sm:$0xff]  }
  0x9f   : > { %460 = vmatpush1.bf16.msra.mxu0 %v1565_v2  ;;  %v1570_v5 = vld [vmem:[#allocation7 + $0x4] ss:$8 sps:$4 sm:$0xff]   ;;  %v1572_v6 = vld [vmem:[#allocation7] ss:$8 sps:$4 sm:$0xff]   ;;  %v1573_v7 = vld [vmem:[#allocation7 + $0x14] ss:$8 sps:$4 sm:$0xff]   ;;  %v420_v2 = vlaneseq }
  0xa0   : > { %461 = vmatprep.subr.bf16.mxu0 %v1566_v3  ;;  %712 = vmatprep.subr.bf16.mxu1 %v1570_v5  ;;  %vm455_vm0 = vcmask 261120   ;;  %v1575_v9 = vld [vmem:[#allocation7 + $0x10] ss:$8 sps:$4 sm:$0xff]   ;;  %v1576_v10 = vld [vmem:[#allocation7 + $0x24] ss:$8 sps:$4 sm:$0xff]   ;;  %s1441_s18 = sshll.u32 %s1984_s13, 7 }
  0xa1   : > { %713 = vmatpush1.bf16.msra.mxu1 %v1572_v6  ;;  %v1578_v11 = vld [vmem:[#allocation7 + $0x20] ss:$8 sps:$4 sm:$0xff]   ;;  %v1579_v12 = vld [vmem:[#allocation7 + $0x34] ss:$8 sps:$4 sm:$0xff]   ;;  %v1581_v13 = vld [vmem:[#allocation7 + $0x30] ss:$8 sps:$4 sm:$0xff]  }
  0xa2   : > { %714 = vmatprep.subr.bf16.mxu1 %v1573_v7  ;;  %v1582_v14 = vld [vmem:[#allocation7 + $0x44] ss:$8 sps:$4 sm:$0xff]   ;;  %v1584_v15 = vld [vmem:[#allocation7 + $0x40] ss:$8 sps:$4 sm:$0xff]   ;;  %v1585_v16 = vld [vmem:[#allocation7 + $0x54] ss:$8 sps:$4 sm:$0xff]  }
  0xa3   : > { %462 = vmatpush1.bf16.msra.mxu0 %v1568_v4  ;;  %v1587_v17 = vld [vmem:[#allocation7 + $0x50] ss:$8 sps:$4 sm:$0xff]   ;;  %v1588_v18 = vld [vmem:[#allocation7 + $0x64] ss:$8 sps:$4 sm:$0xff]   ;;  %v1590_v19 = vld [vmem:[#allocation7 + $0x60] ss:$8 sps:$4 sm:$0xff]  }
  0xa4   : > { %v1591_v20 = vld [vmem:[#allocation7 + $0x74] ss:$8 sps:$4 sm:$0xff]   ;;  %v1593_v21 = vld [vmem:[#allocation7 + $0x70] ss:$8 sps:$4 sm:$0xff]   ;;  %v1594_v22 = vld [vmem:[#allocation7 + $0x84] ss:$8 sps:$4 sm:$0xff]  }
  0xa5   : > { %715 = vmatpush1.bf16.msra.mxu1 %v1575_v9  ;;  %v1596_v23 = vld [vmem:[#allocation7 + $0x80] ss:$8 sps:$4 sm:$0xff]   ;;  %v1597_v24 = vld [vmem:[#allocation7 + $0x94] ss:$8 sps:$4 sm:$0xff]   ;;  %v1599_v25 = vld [vmem:[#allocation7 + $0x90] ss:$8 sps:$4 sm:$0xff]  }
  0xa6   : > { %1349 = vmatmul.mubr.msk.bf16.vlgmr.msra.gmra.mrb[0].mxu0 %vm455_vm0, %v1569_v8  ;;  %716 = vmatprep.subr.bf16.mxu1 %v1576_v10  ;;  %v1600_v26 = vld [vmem:[#allocation7 + $0xa4] ss:$8 sps:$4 sm:$0xff]   ;;  %v1602_v27 = vld [vmem:[#allocation7 + $0xa0] ss:$8 sps:$4 sm:$0xff]   ;;  %v1603_v28 = vld [vmem:[#allocation7 + $0xb4] ss:$8 sps:$4 sm:$0xff]  }
  0xa7   : > { %v1605_v29 = vld [vmem:[#allocation7 + $0xb0] ss:$8 sps:$4 sm:$0xff]   ;;  %v1606_v30 = vld [vmem:[#allocation7 + $0xc4] ss:$8 sps:$4 sm:$0xff]   ;;  %v1608_v31 = vld [vmem:[#allocation7 + $0xc0] ss:$8 sps:$4 sm:$0xff]  }
  0xa8   : > { %v1609_v32 = vld [vmem:[#allocation7 + $0xd4] ss:$8 sps:$4 sm:$0xff]   ;;  %v1611_v33 = vld [vmem:[#allocation7 + $0xd0] ss:$8 sps:$4 sm:$0xff]   ;;  %v1612_v34 = vld [vmem:[#allocation7 + $0xe4] ss:$8 sps:$4 sm:$0xff]  }
  0xa9   : > { %717 = vmatpush1.bf16.msra.mxu1 %v1578_v11  ;;  %v1614_v35 = vld [vmem:[#allocation7 + $0xe0] ss:$8 sps:$4 sm:$0xff]   ;;  %v1615_v36 = vld [vmem:[#allocation7 + $0xf4] ss:$8 sps:$4 sm:$0xff]   ;;  %v1617_v37 = vld [vmem:[#allocation7 + $0xf0] ss:$8 sps:$4 sm:$0xff]  }
  0xaa   : > { %718 = vmatprep.subr.bf16.mxu1 %v1579_v12  ;;  %v1618_v38 = vld [vmem:[#allocation8] ss:$8 sps:$4 sm:$0xff]   ;;  %v1620_v39 = vld [vmem:[#allocation8 + $0x4] ss:$8 sps:$4 sm:$0xff]   ;;  %v1623_v40 = vld [vmem:[#allocation8 + $0x14] ss:$8 sps:$4 sm:$0xff]  }
  0xab   : > { %965 = vmatprep.subr.bf16.mxu0 %v1620_v39  ;;  %v1621_v41 = vld [vmem:[#allocation8 + $0x10] ss:$8 sps:$4 sm:$0xff]   ;;  %v1626_v42 = vld [vmem:[#allocation8 + $0x24] ss:$8 sps:$4 sm:$0xff]   ;;  %v1624_v43 = vld [vmem:[#allocation8 + $0x20] ss:$8 sps:$4 sm:$0xff]  }
  0xac   : > { %966 = vmatpush1.bf16.msra.mxu0 %v1618_v38  ;;  %v1629_v44 = vld [vmem:[#allocation8 + $0x34] ss:$8 sps:$4 sm:$0xff]   ;;  %v1627_v45 = vld [vmem:[#allocation8 + $0x30] ss:$8 sps:$4 sm:$0xff]   ;;  %v1632_v46 = vld [vmem:[#allocation8 + $0x44] ss:$8 sps:$4 sm:$0xff]  }
  0xad   : > { %719 = vmatpush1.bf16.msra.mxu1 %v1581_v13  ;;  %967 = vmatprep.subr.bf16.mxu0 %v1623_v40  ;;  %v1630_v47 = vld [vmem:[#allocation8 + $0x40] ss:$8 sps:$4 sm:$0xff]   ;;  %v1635_v48 = vld [vmem:[#allocation8 + $0x54] ss:$8 sps:$4 sm:$0xff]   ;;  %v1633_v49 = vld [vmem:[#allocation8 + $0x50] ss:$8 sps:$4 sm:$0xff]  }
  0xae   : > { %720 = vmatprep.subr.bf16.mxu1 %v1582_v14  ;;  %v1638_v50 = vld [vmem:[#allocation8 + $0x64] ss:$8 sps:$4 sm:$0xff]   ;;  %v1636_v51 = vld [vmem:[#allocation8 + $0x60] ss:$8 sps:$4 sm:$0xff]   ;;  %v1641_v52 = vld [vmem:[#allocation8 + $0x74] ss:$8 sps:$4 sm:$0xff]  }
  0xaf   : > { %v1639_v53 = vld [vmem:[#allocation8 + $0x70] ss:$8 sps:$4 sm:$0xff]   ;;  %v1644_v54 = vld [vmem:[#allocation8 + $0x84] ss:$8 sps:$4 sm:$0xff]   ;;  %v1642_v55 = vld [vmem:[#allocation8 + $0x80] ss:$8 sps:$4 sm:$0xff]  }
  0xb0   : > { %968 = vmatpush1.bf16.msra.mxu0 %v1621_v41  ;;  %v1647_v56 = vld [vmem:[#allocation8 + $0x94] ss:$8 sps:$4 sm:$0xff]   ;;  %v1645_v57 = vld [vmem:[#allocation8 + $0x90] ss:$8 sps:$4 sm:$0xff]   ;;  %v1650_v58 = vld [vmem:[#allocation8 + $0xa4] ss:$8 sps:$4 sm:$0xff]  }
  0xb1   : > { %721 = vmatpush1.bf16.msra.mxu1 %v1584_v15  ;;  %969 = vmatprep.subr.bf16.mxu0 %v1626_v42  ;;  %v1648_v59 = vld [vmem:[#allocation8 + $0xa0] ss:$8 sps:$4 sm:$0xff]   ;;  %v1653_v60 = vld [vmem:[#allocation8 + $0xb4] ss:$8 sps:$4 sm:$0xff]   ;;  %v1651_v61 = vld [vmem:[#allocation8 + $0xb0] ss:$8 sps:$4 sm:$0xff]  }
  0xb2   : > { %722 = vmatprep.subr.bf16.mxu1 %v1585_v16  ;;  %v1656_v62 = vld [vmem:[#allocation8 + $0xc4] ss:$8 sps:$4 sm:$0xff]   ;;  %v1654_v63 = vld [vmem:[#allocation8 + $0xc0] ss:$8 sps:$4 sm:$0xff]   ;;  %v1659_v0 = vld [vmem:[#allocation8 + $0xd4] ss:$8 sps:$4 sm:$0xff]  }
  0xb3   : > { %v1657_v1 = vld [vmem:[#allocation8 + $0xd0] ss:$8 sps:$4 sm:$0xff]   ;;  %v421_v3 = vshrl.u32 %v420_v2, 7  ;;  %s408_s16 = scalar_lea.vmem [#allocation11], %s1338_s21  ;;  %s2314_s15 = sld [smem:[#allocation18_spill]] }
  0xb4   : > { %970 = vmatpush1.bf16.msra.mxu0 %v1624_v43  ;;  %v418_v5 = vld [vmem:[%s2283_s2] sm:$0x3]  ;;  %s1216_s23 = sshll.u32 %s408_s16, 4  ;;  %s1203_s25 = scalar_lea.sflag [#allocation4], %s2189_s27  ;;  %s2237_s23 = int_to_ptr.vmem [resolvable:$true] %s1216_s23 }
  0xb5   : > { %723 = vmatpush1.bf16.msra.mxu1 %v1587_v17  ;;  %971 = vmatprep.subr.bf16.mxu0 %v1629_v44  ;;  %v2207_v4 = vsub.s32 0, %v421_v3  ;;  %v2212_v6 = vsub.s32 1, %v421_v3  ;;  %v540_v38 = vld [vmem:[%s2285_s4] sm:$0x3]  ;;  %s1824_s14 = scalar_lea.vmem %s2237_s23, 128  ;;  %s1910_s13 = smov [#allocation11]  }
  0xb6   : > { %724 = vmatprep.subr.bf16.mxu1 %v1588_v18  ;;  %p1825_p10 = scmp.ne.s32.totalorder %s2237_s23, %s1824_s14  ;;  %s1828_s21 = sshll.u32 %s1910_s13, 4  ;;  %s1829_s21 = int_to_ptr.vmem [resolvable:$false] %s1828_s21 }
  0xb7   : > { %v423_v7 = vrot.slane %v418_v5, %v2207_v4  ;;  %v427_v8 = vrot.slane %v418_v5, %v2212_v6  ;;  %v545_v39 = vrot.slane %v540_v38, %v2207_v4  ;;  %v549_v40 = vrot.slane %v540_v38, %v2212_v6  ;;  %s1830_s19 = scalar_lea.vmem %s1829_s21, 256  ;;  %p1831_p12 = scmp.lt.s32.totalorder %s2237_s23, %s1829_s21 }
  0xb8   : > { %972 = vmatpush1.bf16.msra.mxu0 %v1627_v45  ;;  %p1826_p5 = pnand %p1825_p10, %p2137_p3  ;;  %p1832_p1 = scmp.lt.s32.totalorder %s1830_s19, %s1824_s14 }
  0xb9   : > { %725 = vmatpush1.bf16.msra.mxu1 %v1590_v19  ;;  %973 = vmatprep.subr.bf16.mxu0 %v1632_v46  ;;  %s2235_s17 = scalar_lea.hbm %s2314_s15, %s1441_s18 }
  0xba   : > { %726 = vmatprep.subr.bf16.mxu1 %v1591_v20  ;;  %p1827_p7 = pneg %p1826_p5  ;;  %p1833_p2 = por %p1832_p1, %p1831_p12 }
  0xbc   : > { %974 = vmatpush1.bf16.msra.mxu0 %v1630_v47  ;;  %p1834_p13 = pnand %p1833_p2, %p1827_p7 }
  0xbd   : > { %727 = vmatpush1.bf16.msra.mxu1 %v1593_v21  ;;  %975 = vmatprep.subr.bf16.mxu0 %v1635_v48 }
  0xbe   : > { %728 = vmatprep.subr.bf16.mxu1 %v1594_v22 }
  0xc0   : > { %976 = vmatpush1.bf16.msra.mxu0 %v1633_v49 }
  0xc1   : > { %729 = vmatpush1.bf16.msra.mxu1 %v1596_v23  ;;  %977 = vmatprep.subr.bf16.mxu0 %v1638_v50  ;;  %v1662_v23 = vld [vmem:[#allocation8 + $0xe4] ss:$8 sps:$4 sm:$0xff]  }
  0xc2   : > { %730 = vmatprep.subr.bf16.mxu1 %v1597_v24  ;;  %v1660_v24 = vld [vmem:[#allocation8 + $0xe0] ss:$8 sps:$4 sm:$0xff]  }
  0xc4   : > { %978 = vmatpush1.bf16.msra.mxu0 %v1636_v51 }
  0xc5   : > { %731 = vmatpush1.bf16.msra.mxu1 %v1599_v25  ;;  %979 = vmatprep.subr.bf16.mxu0 %v1641_v52  ;;  %v1665_v25 = vld [vmem:[#allocation8 + $0xf4] ss:$8 sps:$4 sm:$0xff]  }
  0xc6   : > { %732 = vmatprep.subr.bf16.mxu1 %v1600_v26  ;;  %v1663_v26 = vld [vmem:[#allocation8 + $0xf0] ss:$8 sps:$4 sm:$0xff]  }
  0xc8   : > { %980 = vmatpush1.bf16.msra.mxu0 %v1639_v53 }
  0xc9   : > { %733 = vmatpush1.bf16.msra.mxu1 %v1602_v27  ;;  %981 = vmatprep.subr.bf16.mxu0 %v1644_v54  ;;  %v1666_v27 = vld [vmem:[#allocation10 + $0x40] sm:$0xff]  }
  0xca   : > { %734 = vmatprep.subr.bf16.mxu1 %v1603_v28  ;;  %v1667_v28 = vld [vmem:[#allocation10] sm:$0xff]  }
  0xcc   : > { %982 = vmatpush1.bf16.msra.mxu0 %v1642_v55  ;;  %v1677_v55 = vld [vmem:[#allocation10 + $0x28] sm:$0xff]  }
  0xcd   : > { %735 = vmatpush1.bf16.msra.mxu1 %v1605_v29  ;;  %983 = vmatprep.subr.bf16.mxu0 %v1647_v56  ;;  %v1668_v29 = vld [vmem:[#allocation10 + $0x48] sm:$0xff]   ;;  %v1678_v56 = vld [vmem:[#allocation10 + $0x70] sm:$0xff]  }
  0xce   : > { %736 = vmatprep.subr.bf16.mxu1 %v1606_v30  ;;  %v1669_v30 = vld [vmem:[#allocation10 + $0x8] sm:$0xff]  }
  0xd0   : > { %984 = vmatpush1.bf16.msra.mxu0 %v1645_v57  ;;  %v1679_v57 = vld [vmem:[#allocation10 + $0x30] sm:$0xff]  }
  0xd1   : > { %737 = vmatpush1.bf16.msra.mxu1 %v1608_v31  ;;  %985 = vmatprep.subr.bf16.mxu0 %v1650_v58  ;;  %v1670_v31 = vld [vmem:[#allocation10 + $0x50] sm:$0xff]   ;;  %v1680_v58 = vld [vmem:[#allocation10 + $0x78] sm:$0xff]  }
  0xd2   : > { %738 = vmatprep.subr.bf16.mxu1 %v1609_v32  ;;  %v1671_v32 = vld [vmem:[#allocation10 + $0x10] sm:$0xff]  }
  0xd4   : > { %986 = vmatpush1.bf16.msra.mxu0 %v1648_v59  ;;  %v1681_v59 = vld [vmem:[#allocation10 + $0x38] sm:$0xff]  }
  0xd5   : > { %739 = vmatpush1.bf16.msra.mxu1 %v1611_v33  ;;  %987 = vmatprep.subr.bf16.mxu0 %v1653_v60  ;;  %v1672_v33 = vld [vmem:[#allocation10 + $0x58] sm:$0xff]   ;;  %v793_v60 = vld [vmem:[%s2287_s6] sm:$0x3] }
  0xd6   : > { %740 = vmatprep.subr.bf16.mxu1 %v1612_v34  ;;  %v1673_v34 = vld [vmem:[#allocation10 + $0x18] sm:$0xff]  }
  0xd8   : > { %988 = vmatpush1.bf16.msra.mxu0 %v1651_v61  ;;  %v798_v61 = vrot.slane %v793_v60, %v2207_v4 }
  0xd9   : > { %741 = vmatpush1.bf16.msra.mxu1 %v1614_v35  ;;  %989 = vmatprep.subr.bf16.mxu0 %v1656_v62  ;;  %v1674_v35 = vld [vmem:[#allocation10 + $0x60] sm:$0xff]   ;;  %v802_v62 = vrot.slane %v793_v60, %v2212_v6  ;;  %v1414_v6 = vld [vmem:[%s2289_s8] ss:$0 sm:$0xff] }
  0xda   : > { %742 = vmatprep.subr.bf16.mxu1 %v1615_v36  ;;  %v1675_v36 = vld [vmem:[#allocation10 + $0x20] sm:$0xff]  }
  0xdc   : > { %990 = vmatpush1.bf16.msra.mxu0 %v1654_v63 }
  0xdd   : > { %743 = vmatpush1.bf16.msra.mxu1 %v1617_v37  ;;  %991 = vmatprep.subr.bf16.mxu0 %v1659_v0  ;;  %v1676_v37 = vld [vmem:[#allocation10 + $0x68] sm:$0xff]  }
  0xde   : > { %1447 = vmatprep.subr.bf16.mxu1 %v1666_v27 }
  0xe0   : > { %992 = vmatpush1.bf16.msra.mxu0 %v1657_v1 }
  0xe1   : > { %993 = vmatprep.subr.bf16.mxu0 %v1662_v23 }
  0xe4   : > { %994 = vmatpush1.bf16.msra.mxu0 %v1660_v24 }
  0xe5   : > { %995 = vmatprep.subr.bf16.mxu0 %v1665_v25 }
  0xe8   : > { %996 = vmatpush1.bf16.msra.mxu0 %v1663_v26 }
 0x179   : > { %v493_v9 = vpop.f32.mrb[0].mxu0 }
 0x17a   : > { %v494_v10 = vadd.f32 %v493_v9, %v423_v7  ;;  %v495_v11 = vpop.f32.mrb[1].mxu0 }
 0x17b   : > { %v496_v12 = vadd.f32 %v495_v11, %v427_v8  ;;  %v497_v13 = vpop.f32.mrb[2].mxu0 }
 0x17c   : > { %v498_v14 = vadd.f32 %v497_v13, %v423_v7  ;;  %v499_v15 = vpop.f32.mrb[3].mxu0  ;;  %v502_v17 = vmax.f32 %v494_v10, 0.0 }
 0x17d   : > { %v500_v16 = vadd.f32 %v499_v15, %v427_v8  ;;  %v503_v19 = vmax.f32 %v496_v12, 0.0 }
 0x17e   : > { %v504_v18 = vmax.f32 %v498_v14, 0.0 }
 0x17f   : > { %v505_v20 = vmax.f32 %v500_v16, 0.0 }
 0x180   : > { %v506_v21 = vpack.c.bf16 %v504_v18, %v502_v17 }
 0x181   : > { %v507_v22 = vpack.c.bf16 %v505_v20, %v503_v19 }
 0x183   : > { %744 = vmatprep.mubr.bf16.mxu1 %v507_v22 }
 0x184   : > { %745 = vmatmul.mubr.bf16.vlgmr.msra.gmra.mrb[0].mxu1 %v506_v21 }
 0x185   : > { %1448 = vmatpush3.bf16.msra.mxu1 %v1667_v28 }
 0x186   : > { %1449 = vmatprep.subr.bf16.mxu1 %v1668_v29 }
 0x189   : > { %1450 = vmatpush3.bf16.msra.mxu1 %v1669_v30 }
 0x18a   : > { %1451 = vmatprep.subr.bf16.mxu1 %v1670_v31 }
 0x18d   : > { %1452 = vmatpush3.bf16.msra.mxu1 %v1671_v32 }
 0x18e   : > { %1453 = vmatprep.subr.bf16.mxu1 %v1672_v33 }
 0x191   : > { %1454 = vmatpush3.bf16.msra.mxu1 %v1673_v34 }
 0x192   : > { %1455 = vmatprep.subr.bf16.mxu1 %v1674_v35 }
 0x195   : > { %1456 = vmatpush3.bf16.msra.mxu1 %v1675_v36 }
 0x196   : > { %1457 = vmatprep.subr.bf16.mxu1 %v1676_v37 }
 0x199   : > { %1458 = vmatpush3.bf16.msra.mxu1 %v1677_v55 }
 0x19a   : > { %1459 = vmatprep.subr.bf16.mxu1 %v1678_v56 }
 0x19d   : > { %1460 = vmatpush3.bf16.msra.mxu1 %v1679_v57 }
 0x19e   : > { %1461 = vmatprep.subr.bf16.mxu1 %v1680_v58 }
 0x1a1   : > { %1462 = vmatpush3.bf16.msra.mxu1 %v1681_v59 }
 0x257   : > { %v746_v41 = vpop.f32.mrb[0].mxu1 }
 0x258   : > { %v747_v42 = vadd.f32 %v746_v41, %v545_v39  ;;  %v748_v43 = vpop.f32.mrb[1].mxu1 }
 0x259   : > { %v749_v44 = vadd.f32 %v748_v43, %v549_v40  ;;  %v750_v45 = vpop.f32.mrb[2].mxu1 }
 0x25a   : > { %v751_v46 = vadd.f32 %v750_v45, %v545_v39  ;;  %v752_v47 = vpop.f32.mrb[3].mxu1  ;;  %v755_v49 = vmax.f32 %v747_v42, 0.0 }
 0x25b   : > { %v753_v48 = vadd.f32 %v752_v47, %v549_v40  ;;  %v756_v51 = vmax.f32 %v749_v44, 0.0 }
 0x25c   : > { %v757_v50 = vmax.f32 %v751_v46, 0.0 }
 0x25d   : > { %v758_v52 = vmax.f32 %v753_v48, 0.0 }
 0x25e   : > { %v759_v53 = vpack.c.bf16 %v757_v50, %v755_v49 }
 0x25f   : > { %v760_v54 = vpack.c.bf16 %v758_v52, %v756_v51 }
 0x261   : > { %997 = vmatprep.mubr.bf16.mxu0 %v760_v54 }
 0x262   : > { %998 = vmatmul.mubr.bf16.vlgmr.msra.gmra.mrb[4].mxu0 %v759_v53 }
 0x335   : > { %v999_v63 = vpop.f32.mrb[4].mxu0 }
 0x336   : > { %v1000_v0 = vadd.f32 %v999_v63, %v798_v61  ;;  %v1001_v1 = vpop.f32.mrb[5].mxu0 }
 0x337   : > { %v1002_v2 = vadd.f32 %v1001_v1, %v802_v62  ;;  %v1003_v3 = vpop.f32.mrb[6].mxu0 }
 0x338   : > { %v1004_v5 = vadd.f32 %v1003_v3, %v798_v61  ;;  %v1005_v7 = vpop.f32.mrb[7].mxu0  ;;  %v1008_v9 = vmax.f32 %v1000_v0, 0.0 }
 0x339   : > { %v1006_v8 = vadd.f32 %v1005_v7, %v802_v62  ;;  %v1009_v11 = vmax.f32 %v1002_v2, 0.0 }
 0x33a   : > { %v1010_v10 = vmax.f32 %v1004_v5, 0.0 }
 0x33b   : > { %v1011_v12 = vmax.f32 %v1006_v8, 0.0 }
 0x33c   : > { %v1012_v13 = vpack.c.bf16 %v1010_v10, %v1008_v9 }
 0x33d   : > { %v1013_v14 = vpack.c.bf16 %v1011_v12, %v1009_v11 }
 0x33f   : > { %1181 = vmatprep.mubr.bf16.mxu1 %v1013_v14 }
 0x340   : > { %1182 = vmatmul.mubr.bf16.vlgmr.msra.gmra.mrb[4].mxu1 %v1012_v13 }
 0x413   : > { %v1463_v4 = vpop.f32.mrb[4].mxu1 }
 0x414   : > { %v1464_v15 = vpop.f32.mrb[5].mxu1 }
 0x415   : > { %v1465_v16 = vadd.f32 %v1464_v15, %v1463_v4  ;;  %v1466_v17 = vpop.f32.mrb[6].mxu1 }
 0x416   : > { %v1467_v18 = vpop.f32.mrb[7].mxu1 }
 0x417   : > { %v1184_v19 = vadd.f32 %v1465_v16, %v1414_v6  ;;  %v1468_v20 = vadd.f32 %v1467_v18, %v1466_v17 }
 0x419   : > { %v1187_v21 = vadd.f32 %v1468_v20, %v1414_v6  ;;  %v1190_v22 = vmax.f32 %v1184_v19, 0.0 }
 0x41b   : > { %v1191_v23 = vmax.f32 %v1187_v21, 0.0 }
 0x41d   : > { %v1445_v24 = vpack.c.bf16 %v1191_v23, %v1190_v22 }
 0x41f   : > { %1446 = vst [vmem:[%s408_s16] sm:$0xff] %v1445_v24  }
 0x420   : > { %1837 = shalt.err (!%p1834_p13)
}
 0x421   : > { %s1838_s26 = scalar_lea.hbm %s2235_s17, 128  ;;  %s1842_s18 = scalar_lea.hbm %s2314_s15, 256 }
 0x422   : > { %p1839_p9 = scmp.ne.s32.totalorder %s2235_s17, %s1838_s26  ;;  %p1843_p4 = scmp.lt.u32.totalorder %s2235_s17, %s2314_s15 }
 0x423   : > { %p1844_p8 = scmp.lt.u32.totalorder %s1842_s18, %s1838_s26  ;;  %p1846_p10 = scmp.lt.u32.totalorder %s1838_s26, %s2235_s17 }
 0x424   : > { %p1840_p0 = pnand %p1839_p9, %p2137_p3 }
 0x425   : > { %p1845_p6 = por %p1844_p8, %p1843_p4 }
 0x426   : > { %p1841_p11 = pneg %p1840_p0 }
 0x427   : > { %p1847_p5 = por %p1846_p10, %p1845_p6 }
 0x429   : > { %p1848_p7 = pnand %p1847_p5, %p1841_p11 }
 0x42b   : > { %1851 = shalt.err (!%p1848_p7)
}
 0x42c   : > { %s1911_s22 = smov 64   ;;  %s1912_s14 = smov 4  }
 0x42d   : > { %1487 = dma.vmem_to_hbm [thread:$0]  (%p2137_p3), %s2237_s23, 128, %s2235_s17, %s1203_s25, %s1911_s22, %s1911_s22, %s1912_s14  }
 0x42e PF: > { %s2315_s13 = sld [smem:[#allocation16_spill]]  ;;  %s2316_s21 = sld [smem:[#allocation17_spill]] }
 0x42f   : > { %p2318_p1 = scmp.ge.s32.totalorder %s1898_s12, 2 }
 0x434   : > { %s1231_s19 = sand.u32 1, %s2315_s13   ;;  %p2317_p12 = scmp.ne.s32.totalorder %s2316_s21, 0 }
 0x435   : > { %s1232_s26 = scalar_lea.sflag [#allocation4], %s1231_s19 }
 0x436   : > { %p1507_p2 = pnand %p2318_p1, %p2317_p12 }
 0x438   : > { %1881 = dma.done.wait (!%p1507_p2), %s1232_s26, 128  }
 0x439   : > { %1883 = vsyncadd (!%p1507_p2), %s1232_s26, 4294967168  ;;  %p24_p13 = scmp.ge.s32.totalorder %s2124_s9, 4   ;;  %s2319_s30 = smov %s1890_s10 }
 0x43a   : > { %s2320_s10 = smov %s1894_s11  ;;  %s2321_s11 = smov %s2133_s28 }
 0x43b   : > { %s2322_s12 = smov %s2124_s9  ;;  %26 = sbr.rel (!%p24_p13) target bundleno = 9 (0x9), region = 117 }
 0x442   :  { %1237 = vsyncpa [#allocation3], 1 }
 0x443   :  { %1239 = vsyncpa [#allocation3 + $0x1], 1 }
 0x444   :  { %1240 = vsyncpa [#allocation6], 1 }
 0x445   :  { %1241 = vsyncpa [#allocation9], 1 }
 0x446   :  { %1242 = vsyncpa [#allocation4], 1 }
 0x447   :  { %1244 = vsyncpa [#allocation4 + $0x1], 1 }

</bundles_post_ra>
